<compile_context>
chip_gen: v6e
topology: v6e:2x2x1
jax: 0.10.0
libtpu: 0.0.40
codegen_flags: <defaults>
</compile_context>

<pallas_src>
import functools

import jax
import jax.numpy as jnp
from jax.experimental import pallas as pl
from jax.experimental.pallas import tpu as pltpu


def _choose_tile(dim, preferred, align):
    """Full dim if it fits, else an even split rounded up to `align`.

    Splitting into ceil(dim / preferred) equal-ish tiles minimizes wasted
    padding work on the ragged last tile compared to always using `preferred`.
    """
    if dim <= preferred:
        return dim
    n_tiles = -(-dim // preferred)          # ceil(dim / preferred)
    tile = -(-dim // n_tiles)               # balanced tile size
    tile = -(-tile // align) * align        # round up to hardware alignment
    return tile


def _cos_ams_kernel(num_classes, params_ref, targets_ref, logits_ref,
                    loss_ref, m_ref, s_ref, t_ref):
    """Online-softmax AM-softmax cross-entropy over class tiles.

    grid = (batch tiles, class tiles); class axis is last ("arbitrary").
    Scratch (per batch tile, carried across class tiles):
      m_ref [TB,1] running max, s_ref [TB,1] running exp-sum,
      t_ref [TB,1] margin-adjusted, scaled true-class logit.
    """
    k = pl.program_id(1)
    nc = pl.num_programs(1)

    @pl.when(k == 0)
    def _():
        m_ref[...] = jnp.full(m_ref.shape, -jnp.inf, m_ref.dtype)
        s_ref[...] = jnp.zeros_like(s_ref)
        t_ref[...] = jnp.zeros_like(t_ref)

    margin = params_ref[0]     # SMEM scalar (changes per epoch, no recompile)
    scale = params_ref[1]      # SMEM scalar

    x = logits_ref[...].astype(jnp.float32)                  # [TB, TC] f32
    tb, tc = x.shape

    # Tile-local coordinates: shift the per-row target index (and the valid
    # class limit) instead of adding k*tc to every element of the iota.
    tgt_local = targets_ref[...] - k * tc                     # [TB, 1] int32
    local_col = jax.lax.broadcasted_iota(jnp.int32, (tb, tc), 1)
    tgt_mask = local_col == tgt_local                         # [TB, TC] bool

    # AM-softmax: subtract margin on the true class only, then scale.
    y = jnp.where(tgt_mask, x - margin, x) * scale            # [TB, TC]

    # Mask padded class lanes of a ragged last tile out of the logsumexp.
    if num_classes % tc != 0:
        limit = num_classes - k * tc                          # scalar
        y = jnp.where(local_col < limit, y, -jnp.inf)

    # Online (streaming) logsumexp update.
    m_prev = m_ref[...]
    m_new = jnp.maximum(m_prev, jnp.max(y, axis=-1, keepdims=True))
    alpha = jnp.exp(m_prev - m_new)
    s_ref[...] = alpha * s_ref[...] + jnp.sum(
        jnp.exp(y - m_new), axis=-1, keepdims=True)
    m_ref[...] = m_new

    # Only the class tile containing the target contributes a nonzero term.
    t_ref[...] = t_ref[...] + jnp.sum(
        jnp.where(tgt_mask, y, 0.0), axis=-1, keepdims=True)

    @pl.when(k == nc - 1)
    def _():
        # per-example CE = logsumexp(y) - y[target]
        loss_ref[...] = m_ref[...] + jnp.log(s_ref[...]) - t_ref[...]


def cos_amsoftmax_loss_pallas(logits, targets, margin, scale=30.0,
                              batch_tile=256, class_tile=2048):
    """Pallas equivalent of cos_amsoftmax_loss(y_pred, y_true, margin, scale)."""
    assert logits.ndim == 2 and targets.shape[0] == logits.shape[0]
    B, C = logits.shape

    tb = _choose_tile(B, batch_tile, 8)
    tc = _choose_tile(C, class_tile, 128)
    nb = pl.cdiv(B, tb)
    nc = pl.cdiv(C, tc)

    targets2d = targets.reshape(B, 1).astype(jnp.int32)
    params = jnp.array([margin, scale], dtype=jnp.float32)    # runtime scalars

    in_itemsize = jnp.dtype(logits.dtype).itemsize
    # VMEM budget: double-buffered logits tile + in-kernel f32 temporaries.
    vmem_est = (2 * tb * tc * in_itemsize + 6 * tb * tc * 4
                + 16 * tb * 4 + (2 << 20))
    vmem_limit = int(min(max(vmem_est, 16 << 20), 32 << 20))

    cost = pl.CostEstimate(
        flops=8 * B * C,
        transcendentals=B * C + 2 * B,
        bytes_accessed=B * C * in_itemsize + B * 4 + B * 4,
    )

    per_example = pl.pallas_call(
        functools.partial(_cos_ams_kernel, C),
        out_shape=jax.ShapeDtypeStruct((B, 1), jnp.float32),
        grid=(nb, nc),
        in_specs=[
            pl.BlockSpec(memory_space=pltpu.MemorySpace.SMEM),   # [margin, scale]
            pl.BlockSpec((tb, 1), lambda i, k: (i, 0)),          # targets [B,1]
            pl.BlockSpec((tb, tc), lambda i, k: (i, k)),         # logits  [B,C]
        ],
        out_specs=pl.BlockSpec((tb, 1), lambda i, k: (i, 0)),    # per-row loss
        scratch_shapes=[
            pltpu.VMEM((tb, 1), jnp.float32),   # running max
            pltpu.VMEM((tb, 1), jnp.float32),   # running exp-sum
            pltpu.VMEM((tb, 1), jnp.float32),   # true-class logit
        ],
        compiler_params=pltpu.CompilerParams(
            dimension_semantics=("parallel", "arbitrary"),
            vmem_limit_bytes=vmem_limit),
        cost_estimate=cost,
    )(params, targets2d, logits)

    # Tiny final reduction (B f32 values) in XLA; padded rows never reach HBM.
    return jnp.mean(per_example)


class CosAmsSoftmaxLoss:
    """JAX/Pallas port of antmmf CosAmsSoftmaxLoss (forward only)."""

    def __init__(self, margin_params):
        self.margin_mode = margin_params["margin_mode"]
        assert self.margin_mode in ["constant", "truncate_linear"]
        if self.margin_mode == "constant":
            self.margin = margin_params["margin_value"]
        else:
            self.margin_start = margin_params["margin_start"]
            self.margin_inc = margin_params["margin_inc"]
            self.margin_max = margin_params["margin_max"]

    def __call__(self, sample_list, model_output, current_epoch=0):
        targets = sample_list["targets"]
        logits = model_output["logits"]
        if self.margin_mode == "constant":
            margin = self.margin
        else:
            margin = min(self.margin_start + self.margin_inc * current_epoch,
                         self.margin_max)
        return cos_amsoftmax_loss_pallas(logits, targets, margin)


def _reference_loss(logits, targets, margin, scale=30.0):
    # Pure-JAX reference mirroring the PyTorch function (f32 math).
    logits = logits.astype(jnp.float32)
    B, C = logits.shape
    one_hot = jax.nn.one_hot(targets, C, dtype=logits.dtype)
    y = (one_hot * (logits - margin) + (1.0 - one_hot) * logits) * scale
    logz = jax.scipy.special.logsumexp(y, axis=-1)
    true_logit = jnp.take_along_axis(y, targets[:, None], axis=-1)[:, 0]
    return jnp.mean(logz - true_logit)


if __name__ == "__main__":
    key = jax.random.PRNGKey(0)
    k1, k2, k3, k4 = jax.random.split(key, 4)

    # --- small f32 test (single-tile path), constant margin -----------------
    B, C = 8, 32
    logits = jnp.tanh(jax.random.normal(k1, (B, C), dtype=jnp.float32))
    targets = jax.random.randint(k2, (B,), 0, C, dtype=jnp.int32)

    loss_mod = CosAmsSoftmaxLoss(
        {"margin_mode": "constant", "margin_value": 0.3})
    loss = jax.block_until_ready(
        loss_mod({"targets": targets}, {"logits": logits}))
    ref = _reference_loss(logits, targets, 0.3)
    assert jnp.allclose(loss, ref, rtol=1e-5, atol=1e-5), (loss, ref)

    # --- truncate_linear margin schedule on the same inputs ------------------
    loss_mod_tl = CosAmsSoftmaxLoss(
        {"margin_mode": "truncate_linear",
         "margin_start": 0.0, "margin_inc": 0.7, "margin_max": 0.25})
    loss_tl = jax.block_until_ready(
        loss_mod_tl({"targets": targets}, {"logits": logits}, current_epoch=1))
    ref_tl = _reference_loss(logits, targets, 0.25)
    assert jnp.allclose(loss_tl, ref_tl, rtol=1e-5, atol=1e-5), (loss_tl, ref_tl)

    # --- bf16 test exercising batch/class tiling + ragged last tiles --------
    B2, C2 = 44, 1500
    logits2 = jnp.tanh(
        jax.random.normal(k3, (B2, C2), dtype=jnp.float32)).astype(jnp.bfloat16)
    targets2 = jax.random.randint(k4, (B2,), 0, C2, dtype=jnp.int32)

    loss2 = jax.block_until_ready(
        cos_amsoftmax_loss_pallas(logits2, targets2, 0.25,
                                  batch_tile=32, class_tile=640))
    ref2 = _reference_loss(logits2, targets2, 0.25)
    assert jnp.allclose(loss2, ref2, rtol=1e-4, atol=1e-4), (loss2, ref2)

    print("KERNEL_OK")
</pallas_src>

<mosaic_0001>
module attributes {stable_mosaic.version = 11 : i64} {
  func.func @_cos_ams_kernel(%arg0: i32, %arg1: i32, %arg2: memref<2xf32, #tpu.memory_space<smem>>, %arg3: memref<8x1xi32, #tpu.memory_space<vmem>>, %arg4: memref<8x32xf32, #tpu.memory_space<vmem>>, %arg5: memref<8x1xf32, #tpu.memory_space<vmem>>, %arg6: memref<8x1xf32, #tpu.memory_space<vmem>>, %arg7: memref<8x1xf32, #tpu.memory_space<vmem>>, %arg8: memref<8x1xf32, #tpu.memory_space<vmem>>) attributes {dimension_semantics = [#tpu.dimension_semantics<parallel>, #tpu.dimension_semantics<arbitrary>], iteration_bounds = array<i64: 1, 1>, scalar_prefetch = 0 : i64, scratch_operands = 3 : i64, tpu.core_type = #tpu.core_type<tc>, window_params = [{transform_indices = @transform_0, window_bounds = array<i64: 2>}, {transform_indices = @transform_1, window_bounds = array<i64: 8, 1>}, {transform_indices = @transform_2, window_bounds = array<i64: 8, 32>}, {transform_indices = @transform_3, window_bounds = array<i64: 8, 1>}]} {
    %c0_i32 = arith.constant 0 : i32
    %0 = arith.cmpi eq, %arg1, %c0_i32 : i32
    %1 = arith.extui %0 : i1 to i32
    %c0_i32_0 = arith.constant 0 : i32
    %2 = arith.cmpi ne, %1, %c0_i32_0 : i32
    scf.if %2 {
      %cst_22 = arith.constant 0xFF800000 : f32
      %44 = vector.broadcast %cst_22 : f32 to vector<8x1xf32>
      %c0_23 = arith.constant 0 : index
      %c0_24 = arith.constant 0 : index
      %45 = vector.load %arg6[%c0_23, %c0_24] : memref<8x1xf32, #tpu.memory_space<vmem>>, vector<8x1xf32>
      tpu.vector_store %arg6[%c0_23, %c0_24], %44 {strides = array<i32>} : memref<8x1xf32, #tpu.memory_space<vmem>>, vector<8x1xf32>,
      %cst_25 = arith.constant 0.000000e+00 : f32
      %46 = vector.broadcast %cst_25 : f32 to vector<8x1xf32>
      %c0_26 = arith.constant 0 : index
      %c0_27 = arith.constant 0 : index
      %47 = vector.load %arg7[%c0_26, %c0_27] : memref<8x1xf32, #tpu.memory_space<vmem>>, vector<8x1xf32>
      tpu.vector_store %arg7[%c0_26, %c0_27], %46 {strides = array<i32>} : memref<8x1xf32, #tpu.memory_space<vmem>>, vector<8x1xf32>,
      %cst_28 = arith.constant 0.000000e+00 : f32
      %48 = vector.broadcast %cst_28 : f32 to vector<8x1xf32>
      %c0_29 = arith.constant 0 : index
      %c0_30 = arith.constant 0 : index
      %49 = vector.load %arg8[%c0_29, %c0_30] : memref<8x1xf32, #tpu.memory_space<vmem>>, vector<8x1xf32>
      tpu.vector_store %arg8[%c0_29, %c0_30], %48 {strides = array<i32>} : memref<8x1xf32, #tpu.memory_space<vmem>>, vector<8x1xf32>,
    } else {
    }
    %c0 = arith.constant 0 : index
    %3 = memref.load %arg2[%c0] : memref<2xf32, #tpu.memory_space<smem>>
    %c1 = arith.constant 1 : index
    %4 = memref.load %arg2[%c1] : memref<2xf32, #tpu.memory_space<smem>>
    %c0_1 = arith.constant 0 : index
    %c0_2 = arith.constant 0 : index
    %5 = vector.load %arg4[%c0_1, %c0_2] : memref<8x32xf32, #tpu.memory_space<vmem>>, vector<8x32xf32>
    %c0_3 = arith.constant 0 : index
    %c0_4 = arith.constant 0 : index
    %6 = vector.load %arg3[%c0_3, %c0_4] : memref<8x1xi32, #tpu.memory_space<vmem>>, vector<8x1xi32>
    %c32_i32 = arith.constant 32 : i32
    %7 = arith.muli %arg1, %c32_i32 : i32
    %8 = vector.broadcast %7 : i32 to vector<8x1xi32>
    %9 = arith.subi %6, %8 : vector<8x1xi32>
    %10 = tpu.iota {dimensions = array<i32: 1>} : vector<8x32xi32>
    %11 = vector.broadcast %9 : vector<8x1xi32> to vector<8x32xi32>
    %12 = arith.cmpi eq, %10, %11 : vector<8x32xi32>
    %13 = vector.broadcast %3 : f32 to vector<8x32xf32>
    %14 = arith.subf %5, %13 : vector<8x32xf32>
    %15 = arith.select %12, %14, %5 : vector<8x32xi1>, vector<8x32xf32>
    %16 = vector.broadcast %4 : f32 to vector<8x32xf32>
    %17 = arith.mulf %15, %16 : vector<8x32xf32>
    %c0_5 = arith.constant 0 : index
    %c0_6 = arith.constant 0 : index
    %18 = vector.load %arg6[%c0_5, %c0_6] : memref<8x1xf32, #tpu.memory_space<vmem>>, vector<8x1xf32>
    %cst = arith.constant dense<0xFF800000> : vector<8xf32>
    %19 = vector.multi_reduction <maximumf>, %17, %cst [1] : vector<8x32xf32> to vector<8xf32>
    %20 = vector.shape_cast %19 : vector<8xf32> to vector<8x1xf32>
    %21 = arith.maximumf %18, %20 : vector<8x1xf32>
    %22 = arith.subf %18, %21 : vector<8x1xf32>
    %23 = math.exp %22 : vector<8x1xf32>
    %c0_7 = arith.constant 0 : index
    %c0_8 = arith.constant 0 : index
    %24 = vector.load %arg7[%c0_7, %c0_8] : memref<8x1xf32, #tpu.memory_space<vmem>>, vector<8x1xf32>
    %25 = arith.mulf %23, %24 : vector<8x1xf32>
    %26 = vector.broadcast %21 : vector<8x1xf32> to vector<8x32xf32>
    %27 = arith.subf %17, %26 : vector<8x32xf32>
    %28 = math.exp %27 : vector<8x32xf32>
    %cst_9 = arith.constant dense<0.000000e+00> : vector<8xf32>
    %29 = vector.multi_reduction <add>, %28, %cst_9 [1] : vector<8x32xf32> to vector<8xf32>
    %30 = vector.shape_cast %29 : vector<8xf32> to vector<8x1xf32>
    %31 = arith.addf %25, %30 : vector<8x1xf32>
    %c0_10 = arith.constant 0 : index
    %c0_11 = arith.constant 0 : index
    %32 = vector.load %arg7[%c0_10, %c0_11] : memref<8x1xf32, #tpu.memory_space<vmem>>, vector<8x1xf32>
    tpu.vector_store %arg7[%c0_10, %c0_11], %31 {strides = array<i32>} : memref<8x1xf32, #tpu.memory_space<vmem>>, vector<8x1xf32>,
    %c0_12 = arith.constant 0 : index
    %c0_13 = arith.constant 0 : index
    %33 = vector.load %arg6[%c0_12, %c0_13] : memref<8x1xf32, #tpu.memory_space<vmem>>, vector<8x1xf32>
    tpu.vector_store %arg6[%c0_12, %c0_13], %21 {strides = array<i32>} : memref<8x1xf32, #tpu.memory_space<vmem>>, vector<8x1xf32>,
    %c0_14 = arith.constant 0 : index
    %c0_15 = arith.constant 0 : index
    %34 = vector.load %arg8[%c0_14, %c0_15] : memref<8x1xf32, #tpu.memory_space<vmem>>, vector<8x1xf32>
    %cst_16 = arith.constant 0.000000e+00 : f32
    %35 = vector.broadcast %cst_16 : f32 to vector<8x32xf32>
    %36 = arith.select %12, %17, %35 : vector<8x32xi1>, vector<8x32xf32>
    %cst_17 = arith.constant dense<0.000000e+00> : vector<8xf32>
    %37 = vector.multi_reduction <add>, %36, %cst_17 [1] : vector<8x32xf32> to vector<8xf32>
    %38 = vector.shape_cast %37 : vector<8xf32> to vector<8x1xf32>
    %39 = arith.addf %34, %38 : vector<8x1xf32>
    %c0_18 = arith.constant 0 : index
    %c0_19 = arith.constant 0 : index
    %40 = vector.load %arg8[%c0_18, %c0_19] : memref<8x1xf32, #tpu.memory_space<vmem>>, vector<8x1xf32>
    tpu.vector_store %arg8[%c0_18, %c0_19], %39 {strides = array<i32>} : memref<8x1xf32, #tpu.memory_space<vmem>>, vector<8x1xf32>,
    %c0_i32_20 = arith.constant 0 : i32
    %41 = arith.cmpi eq, %arg1, %c0_i32_20 : i32
    %42 = arith.extui %41 : i1 to i32
    %c0_i32_21 = arith.constant 0 : i32
    %43 = arith.cmpi ne, %42, %c0_i32_21 : i32
    scf.if %43 {
      %c0_22 = arith.constant 0 : index
      %c0_23 = arith.constant 0 : index
      %44 = vector.load %arg6[%c0_22, %c0_23] : memref<8x1xf32, #tpu.memory_space<vmem>>, vector<8x1xf32>
      %c0_24 = arith.constant 0 : index
      %c0_25 = arith.constant 0 : index
      %45 = vector.load %arg7[%c0_24, %c0_25] : memref<8x1xf32, #tpu.memory_space<vmem>>, vector<8x1xf32>
      %46 = math.log %45 : vector<8x1xf32>
      %47 = arith.addf %44, %46 : vector<8x1xf32>
      %c0_26 = arith.constant 0 : index
      %c0_27 = arith.constant 0 : index
      %48 = vector.load %arg8[%c0_26, %c0_27] : memref<8x1xf32, #tpu.memory_space<vmem>>, vector<8x1xf32>
      %49 = arith.subf %47, %48 : vector<8x1xf32>
      %c0_28 = arith.constant 0 : index
      %c0_29 = arith.constant 0 : index
      %50 = vector.load %arg5[%c0_28, %c0_29] : memref<8x1xf32, #tpu.memory_space<vmem>>, vector<8x1xf32>
      tpu.vector_store %arg5[%c0_28, %c0_29], %49 {strides = array<i32>} : memref<8x1xf32, #tpu.memory_space<vmem>>, vector<8x1xf32>,
    } else {
    }
    return
  }
  func.func @transform_0(%arg0: i32, %arg1: i32) -> i32 {
    %c0_i32 = arith.constant 0 : i32
    %c0_i32_0 = arith.constant 0 : i32
    return %c0_i32 : i32
  }
  func.func @transform_1(%arg0: i32, %arg1: i32) -> (i32, i32) {
    %c0_i32 = arith.constant 0 : i32
    %c0_i32_0 = arith.constant 0 : i32
    return %arg0, %c0_i32 : i32, i32
  }
  func.func @transform_2(%arg0: i32, %arg1: i32) -> (i32, i32) {
    %c0_i32 = arith.constant 0 : i32
    return %arg0, %arg1 : i32, i32
  }
  func.func @transform_3(%arg0: i32, %arg1: i32) -> (i32, i32) {
    %c0_i32 = arith.constant 0 : i32
    %c0_i32_0 = arith.constant 0 : i32
    return %arg0, %c0_i32 : i32, i32
  }
}

</mosaic_0001>

<bundles_post_ra>
// kernel: tpu_custom_call.1
= control target key start
LH: loop header
LB: loop body
LE: loop exit
PB: predicated region body
PF: predicated region fallthrough
CT: control target
= control target key end

     0   :  { %8 = vsyncpa [#allocation6], 0  ;;  %s175_s0 = inlined_call_operand.vmem [shape: f32[2], index: 0, kind: input, shape index: {}]   ;;  %s176_s1 = inlined_call_operand.vmem [shape: s32[8,1], index: 1, kind: input, shape index: {}]   ;;  %s177_s2 = inlined_call_operand.vmem [shape: f32[8,32], index: 2, kind: input, shape index: {}]   ;;  %s178_s3 = inlined_call_operand.vmem [shape: f32[8,1], index: 3, kind: output, shape index: {}]  }
   0x1   :  { %s15_s14 = sshll.u32 %s175_s0, 4  ;;  %s16_s14 = int_to_ptr.vmem [resolvable:$true] %s15_s14 }
   0x2   :  { %s115_s15 = scalar_lea.vmem %s16_s14, 16  ;;  %p120_p1 = scmp.lt.s32.totalorder %s16_s14, %s16_s14 }
   0x3   :  { %p116_p0 = scmp.ne.s32.totalorder %s16_s14, %s115_s15  ;;  %p121_p2 = scmp.lt.s32.totalorder %s115_s15, %s115_s15 }
   0x5   :  { %p122_p3 = por %p121_p2, %p120_p1 }
   0x7   :  { %p123_p4 = pnand %p122_p3, %p116_p0 }
   0x9   :  { %126 = shalt.err (!%p123_p4)
}
   0xa   :  { %s129_s16 = smov [#allocation5]  }
   0xb   :  { %18 = dma.vmem_to_smem %s16_s14, 16, %s129_s16, [#allocation6]  }
   0xc   :  { %127 = dma.done.wait [#allocation6], 16  }
   0xd   :  { %128 = vsyncadd [#allocation6], 4294967280 }
   0xe   :  { %26 = sfence }
   0xf   :  { %v38_v0 = vld [vmem:[%s176_s1] sm:$0xff]  ;;  %v130_v1 = vmov 0   ;;  %s35_s0 = sld [smem:[#allocation5]]  ;;  %v42_v2 = vlaneseq  ;;  %vm54_vm1 = vcmask 261120   ;;  %vm31_vm2 = vcmask 7168  }
  0x10   :  { %107 = vset.pattern.permute.xlu0 %v130_v1  ;;  %108 = vset.pattern.permute.xlu1 %v130_v1  ;;  %s102_s19 = sld [smem:[#allocation5 + $0x1]]  ;;  %v37_v3 = vld [vmem:[%s177_s2] sm:$0xff]  ;;  %v131_v13 = vmov -inf   ;;  %v132_v15 = vmov 0.0  }
  0x11   :  { %45 = vperm.xlu0 %107, %v38_v0   ;;  %v43_v5 = vand.u32 127, %v42_v2  ;;  %32 = vst.msk [vmem:[#allocation2] sm:$0xff] %vm31_vm2, %v131_v13  ;;  %34 = vst.msk [vmem:[#allocation4] sm:$0xff] %vm31_vm2, %v132_v15 }
  0x12   :  { %33 = vst.msk [vmem:[#allocation3] sm:$0xff] %vm31_vm2, %v132_v15 }
  0x15   :  { %v48_v4 = vstv %s35_s0 }
  0x16   :  { %v49_v6 = vsub.f32 %v37_v3, %v48_v4  ;;  %v51_v8 = vstv %s102_s19 }
  0x18   :  { %v53_v16 = vld [vmem:[#allocation2] sm:$0xff]  ;;  %v79_v19 = vld [vmem:[#allocation4] sm:$0xff] }
  0x19   :  { %v62_v30 = vld [vmem:[#allocation3] sm:$0xff] }
  0x8c   :  { %v46_v7 = vpop.permute.xlu0 %45 }
  0x8d   :  { %vm47_vm0 = vcmp.eq.s32.totalorder %v43_v5, %v46_v7 }
  0x8e   :  { %v50_v9 = vsel %vm47_vm0, %v49_v6, %v37_v3 }
  0x8f   :  { %v52_v10 = vmul.f32 %v51_v8, %v50_v9 }
  0x91   :  { %v55_v11 = vsel %vm54_vm1, %v52_v10, -inf  ;;  %v80_v12 = vsel %vm47_vm0, %v52_v10, 0.0 }
  0x92   :  { %56 = vmax.xlane.f32.xlu0 %v55_v11  ;;  %v81_v14 = vsel %vm54_vm1, %v80_v12, 0.0 }
  0x96   :  { %82 = vadd.xlane.f32.xlu0 %v81_v14 }
 0x11b   :  { %v57_v17 = vpop.xlane.xlu0 %56 }
 0x11c   :  { %v58_v18 = vmax.f32 %v53_v16, %v57_v17 }
 0x11e   :  { %v59_v20 = vsub.f32 %v53_v16, %v58_v18  ;;  %78 = vst.msk [vmem:[#allocation2] sm:$0xff] %vm31_vm2, %v58_v18  ;;  %66 = vperm.xlu1 %108, %v58_v18  }
 0x11f   :  { %v83_v21 = vpop.xlane.xlu0 %82 }
 0x120   :  { %v84_v22 = vadd.f32 %v83_v21, %v79_v19  ;;  %v60_v28 = vmul.f32 1.442695, %v59_v20 }
 0x122   :  { %85 = vst.msk [vmem:[#allocation4] sm:$0xff] %vm31_vm2, %v84_v22 }
 0x125   :  { %v89_v37 = vld [vmem:[#allocation2] sm:$0xff] }
 0x129   :  { %v94_v39 = vld [vmem:[#allocation4] sm:$0xff] }
 0x199   :  { %v67_v23 = vpop.permute.xlu1 %66 }
 0x19a   :  { %v69_v24 = vsub.f32 %v52_v10, %v67_v23 }
 0x19c   :  { %v70_v25 = vmul.f32 1.442695, %v69_v24 }
 0x19e   :  { %109 = vpow2.f32 %v70_v25 }
 0x19f   :  { %111 = vpow2.f32 %v60_v28 }
 0x1ab   :  { %v110_v26 = vpop.eup %109 }
 0x1ac   :  { %v72_v27 = vsel %vm54_vm1, %v110_v26, 0.0  ;;  %v112_v29 = vpop.eup %111 }
 0x1ad   :  { %73 = vadd.xlane.f32.xlu1 %v72_v27  ;;  %v63_v31 = vmul.f32 %v112_v29, %v62_v30 }
 0x236   :  { %v74_v32 = vpop.xlane.xlu1 %73 }
 0x237   :  { %v75_v33 = vadd.f32 %v74_v32, %v63_v31 }
 0x239   :  { %77 = vst.msk [vmem:[#allocation3] sm:$0xff] %vm31_vm2, %v75_v33 }
 0x240   :  { %v90_v34 = vld [vmem:[#allocation3] sm:$0xff] }
 0x241   :  { %113 = vlog2.f32 %v90_v34 }
 0x24e   :  { %v114_v35 = vpop.eup %113 }
 0x24f   :  { %v92_v36 = vmul.f32 0.6931472, %v114_v35 }
 0x251   :  { %v93_v38 = vadd.f32 %v92_v36, %v89_v37 }
 0x253   :  { %v95_v40 = vsub.f32 %v93_v38, %v94_v39 }
 0x255   :  { %96 = vst.msk [vmem:[%s178_s3] sm:$0xff] %vm31_vm2, %v95_v40 }
 0x256   :  { %101 = vsyncpa [#allocation6], 1 }

</bundles_post_ra>
